<compile_context>
chip_gen: v5e
topology: v5e:2x2
jax: 0.10.0
libtpu: 0.0.40
codegen_flags: <defaults>
</compile_context>

<pallas_src>
import functools

import jax
import jax.numpy as jnp
from jax import lax
from jax.experimental import pallas as pl
from jax.experimental.pallas import tpu as pltpu


def _round_up(x, m):
    return (x + m - 1) // m * m


def _online_contrastive_kernel(
    ti_ref, tj_ref,                       # scalar-prefetch tile-pair tables (SMEM)
    ei_ref, ejt_ref,                      # (RB, D) rows / (D, CB) transposed cols
    ni_ref, li_ref,                       # (RB, 1) squared norms / labels (i side)
    nj_ref, lj_ref,                       # (T_cols, CB) resident norms / labels (j side)
    out_ref,                              # (1, 1) f32 scalar output in SMEM
    acc_ref,                              # (RB, CB) f32 VMEM accumulator
    *, margin, batch, row_block, col_block, inv_num_pairs,
):
    g = pl.program_id(0)

    @pl.when(g == 0)
    def _init():
        acc_ref[...] = jnp.zeros_like(acc_ref)

    ti = ti_ref[g]
    tj = tj_ref[g]
    r0 = ti * row_block
    c0 = tj * col_block

    # Gram block on the MXU: (RB, D) @ (D, CB), f32 accumulation.
    gram = jnp.dot(ei_ref[...], ejt_ref[...], preferred_element_type=jnp.float32)

    # j-side norms / labels are resident in VMEM; grab the tj-th row (1, CB).
    nj = nj_ref[pl.ds(tj, 1), :]
    lj = lj_ref[pl.ds(tj, 1), :]

    # d2[i, j] = ||e_i||^2 + ||e_j||^2 - 2 <e_i, e_j>  (clamped at 0), all f32.
    d2 = jnp.maximum(ni_ref[...] + nj - 2.0 * gram, 0.0)
    same = li_ref[...] == lj
    neg_term = jnp.square(jnp.maximum(margin - jnp.sqrt(d2), 0.0))
    loss_tile = jnp.where(same, d2, neg_term)

    # Masking is only needed on blocks that touch the diagonal or the padded
    # tail; interior blocks skip the iota/compare/select epilogue entirely.
    needs_mask = ((r0 + row_block) > c0) | ((c0 + col_block) > batch)

    @pl.when(needs_mask)
    def _edge_block():
        row = r0 + lax.broadcasted_iota(jnp.int32, (row_block, col_block), 0)
        col = c0 + lax.broadcasted_iota(jnp.int32, (row_block, col_block), 1)
        # row < col < batch also eliminates every padded row/col (padded labels
        # are never relied upon).
        keep = (row < col) & (col < batch)
        acc_ref[...] += jnp.where(keep, loss_tile, 0.0)

    @pl.when(jnp.logical_not(needs_mask))
    def _interior_block():
        acc_ref[...] += loss_tile

    @pl.when(g == pl.num_programs(0) - 1)
    def _finalize():
        out_ref[0, 0] = jnp.sum(acc_ref[...]) * inv_num_pairs


def online_contrastive_loss(embeddings, target, margin=1.0, *,
                            col_block=256, mxu_dtype=None,
                            vmem_budget_bytes=26 << 20):
    B, D = embeddings.shape
    if B < 2:
        # No pairs -> torch's loss.mean() over an empty tensor is NaN (intentional).
        return jnp.float32(jnp.nan)

    if mxu_dtype is None:
        # bf16 MXU inputs by default: v6e/v7x have no native f32 MXU path and it
        # halves the streamed e_j traffic.  Norms + epilogue stay in f32.
        mxu_dtype = jnp.bfloat16
    isz = jnp.dtype(mxu_dtype).itemsize

    # Column (j) tile: lane-aligned, capped by the padded batch.
    B128 = _round_up(B, 128)
    CB = min(max(128, _round_up(int(col_block), 128)), B128)

    # i-superblock height RB = Ci*CB; pick the largest Ci that fits the VMEM
    # budget -- each streamed e_j tile is reused against Ci*CB resident rows.
    max_ci = max(1, _round_up(B, CB) // CB)
    approx_tcols = _round_up(B, CB) // CB + 4

    def vmem_need(rb):
        return (2 * rb * D * isz            # e_i block, double-buffered
                + 2 * D * CB * isz          # e_j^T block, double-buffered
                + rb * CB * 4               # f32 accumulator scratch
                + 4 * rb * 128 * 4          # (RB,1) norm/label blocks, lane-padded
                + 2 * approx_tcols * CB * 4)  # resident j-side norm/label rows

    ci = 1
    for cand in (4, 3, 2):
        if cand <= max_ci and vmem_need(cand * CB) <= vmem_budget_bytes:
            ci = cand
            break
    RB = ci * CB
    Bp = _round_up(B, RB)
    pad = Bp - B
    T_rows = Bp // RB
    T_cols = Bp // CB

    # Norms computed (in f32) from the MXU-dtype values so d2 = ni+nj-2*gram is
    # internally consistent with the gram (better cancellation for positives).
    emb_mxu = embeddings.astype(mxu_dtype)
    emb_f = emb_mxu.astype(jnp.float32)
    sq = jnp.sum(emb_f * emb_f, axis=1)                          # (B,) f32
    labels = target.astype(jnp.int32)
    if pad:
        emb_mxu = jnp.pad(emb_mxu, ((0, pad), (0, 0)))
        sq = jnp.pad(sq, (0, pad))
        # Padded labels are -1 but correctness does NOT depend on it: the
        # (row < col < B) mask removes every padded row/col.
        labels = jnp.pad(labels, (0, pad), constant_values=-1)

    emb_t = jnp.transpose(emb_mxu)                               # (D, Bp)
    sq_col = sq.reshape(Bp, 1)
    lab_col = labels.reshape(Bp, 1)
    sq_rows = sq.reshape(T_cols, CB)                             # VMEM-resident
    lab_rows = labels.reshape(T_cols, CB)                        # VMEM-resident

    # Upper-triangular (i-superblock, j-tile) enumeration; i outer so the big
    # e_i block stays resident while e_j tiles stream.
    ti_list, tj_list = [], []
    for I in range(T_rows):
        r0 = I * RB
        for j in range(T_cols):
            c0 = j * CB
            if c0 + CB <= r0 + 1:          # entirely on/below the diagonal
                continue
            if c0 >= B or r0 + 1 >= B:     # no (row < col < B) pair possible
                continue
            ti_list.append(I)
            tj_list.append(j)
    ti_idx = jnp.asarray(ti_list, dtype=jnp.int32)
    tj_idx = jnp.asarray(tj_list, dtype=jnp.int32)
    num_tile_pairs = len(ti_list)

    num_pairs = B * (B - 1) // 2
    kernel = functools.partial(
        _online_contrastive_kernel,
        margin=float(margin), batch=B,
        row_block=RB, col_block=CB,
        inv_num_pairs=1.0 / float(num_pairs))

    vmem_limit = int(min(max(vmem_need(RB) + (8 << 20), 32 << 20), 64 << 20))

    grid_spec = pltpu.PrefetchScalarGridSpec(
        num_scalar_prefetch=2,
        grid=(num_tile_pairs,),
        in_specs=[
            pl.BlockSpec((RB, D), lambda g, ti, tj: (ti[g], 0)),   # e_i superblock
            pl.BlockSpec((D, CB), lambda g, ti, tj: (0, tj[g])),   # e_j^T tile (streamed)
            pl.BlockSpec((RB, 1), lambda g, ti, tj: (ti[g], 0)),   # ||e_i||^2
            pl.BlockSpec((RB, 1), lambda g, ti, tj: (ti[g], 0)),   # labels_i
            pl.BlockSpec(memory_space=pltpu.MemorySpace.VMEM),     # ||e_j||^2 (resident)
            pl.BlockSpec(memory_space=pltpu.MemorySpace.VMEM),     # labels_j (resident)
        ],
        out_specs=pl.BlockSpec(memory_space=pltpu.MemorySpace.SMEM),
        scratch_shapes=[pltpu.VMEM((RB, CB), jnp.float32)],
    )

    out = pl.pallas_call(
        kernel,
        out_shape=jax.ShapeDtypeStruct((1, 1), jnp.float32),
        grid_spec=grid_spec,
        compiler_params=pltpu.CompilerParams(
            dimension_semantics=("arbitrary",),     # scalar accumulation across tiles
            vmem_limit_bytes=vmem_limit),
    )(ti_idx, tj_idx, emb_mxu, emb_t, sq_col, lab_col, sq_rows, lab_rows)
    return out[0, 0]


def reference_loss(embeddings, target, margin=1.0):
    # Pure-JAX reference mirroring the PyTorch forward with the all-pairs selector.
    B = embeddings.shape[0]
    idx_i, idx_j = jnp.triu_indices(B, k=1)
    emb = embeddings.astype(jnp.float32)
    diff = emb[idx_i] - emb[idx_j]
    d2 = jnp.sum(diff ** 2, axis=1)
    same = target[idx_i] == target[idx_j]
    pos = jnp.where(same, d2, 0.0)
    neg = jnp.where(same, 0.0, jnp.maximum(margin - jnp.sqrt(d2), 0.0) ** 2)
    return (jnp.sum(pos) + jnp.sum(neg)) / idx_i.shape[0]


if __name__ == "__main__":
    key = jax.random.PRNGKey(0)
    k1, k2, k3, k4, k5, k6 = jax.random.split(key, 6)

    # 1) Single-tile case, f32 MXU path (tight tolerance).
    B, D = 8, 32
    emb = jax.random.normal(k1, (B, D), dtype=jnp.float32)
    lab = jax.random.randint(k2, (B,), 0, 2, dtype=jnp.int32)
    loss = jax.block_until_ready(
        online_contrastive_loss(emb, lab, margin=10.0, mxu_dtype=jnp.float32))
    ref = reference_loss(emb, lab, margin=10.0)
    assert jnp.allclose(loss, ref, rtol=1e-4, atol=1e-4), (loss, ref)

    # 2) Multi-column-tile case with padding (Ci=2 superblock); f32 (tight) and
    #    the default bf16 MXU path (loose tolerance).
    B2, D2 = 300, 64
    emb2 = jax.random.normal(k3, (B2, D2), dtype=jnp.float32)
    lab2 = jax.random.randint(k4, (B2,), 0, 4, dtype=jnp.int32)
    ref2 = reference_loss(emb2, lab2, margin=15.0)
    loss2_f32 = jax.block_until_ready(
        online_contrastive_loss(emb2, lab2, margin=15.0, mxu_dtype=jnp.float32))
    assert jnp.allclose(loss2_f32, ref2, rtol=2e-4, atol=1e-3), (loss2_f32, ref2)
    loss2_bf16 = jax.block_until_ready(
        online_contrastive_loss(emb2, lab2, margin=15.0))   # default bf16 MXU
    assert jnp.allclose(loss2_bf16, ref2, rtol=5e-2, atol=5e-2), (loss2_bf16, ref2)

    # 3) Multi-superblock case: exercises the unmasked interior fast path,
    #    row padding, and the resident-i-superblock reuse.  f32 MXU (tight).
    B3, D3 = 640, 48
    emb3 = jax.random.normal(k5, (B3, D3), dtype=jnp.float32)
    lab3 = jax.random.randint(k6, (B3,), 0, 8, dtype=jnp.int32)
    ref3 = reference_loss(emb3, lab3, margin=1.0)
    loss3 = jax.block_until_ready(
        online_contrastive_loss(emb3, lab3, margin=1.0, col_block=128,
                                mxu_dtype=jnp.float32))
    assert jnp.allclose(loss3, ref3, rtol=2e-4, atol=1e-3), (loss3, ref3)

    print("KERNEL_OK")
</pallas_src>

<mosaic_0001>
module attributes {stable_mosaic.version = 11 : i64} {
  func.func @_online_contrastive_kernel(%arg0: i32, %arg1: memref<1xi32, #tpu.memory_space<smem>>, %arg2: memref<1xi32, #tpu.memory_space<smem>>, %arg3: memref<128x32xf32, #tpu.memory_space<vmem>>, %arg4: memref<32x128xf32, #tpu.memory_space<vmem>>, %arg5: memref<128x1xf32, #tpu.memory_space<vmem>>, %arg6: memref<128x1xi32, #tpu.memory_space<vmem>>, %arg7: memref<1x128xf32, #tpu.memory_space<vmem>>, %arg8: memref<1x128xi32, #tpu.memory_space<vmem>>, %arg9: memref<1x1xf32, #tpu.memory_space<smem>>, %arg10: memref<128x128xf32, #tpu.memory_space<vmem>>) attributes {dimension_semantics = [#tpu.dimension_semantics<arbitrary>], iteration_bounds = array<i64: 1>, scalar_prefetch = 2 : i64, scratch_operands = 1 : i64, tpu.core_type = #tpu.core_type<tc>, window_params = [{transform_indices = @transform_0, window_bounds = array<i64: 128, 32>}, {transform_indices = @transform_1, window_bounds = array<i64: 32, 128>}, {transform_indices = @transform_2, window_bounds = array<i64: 128, 1>}, {transform_indices = @transform_3, window_bounds = array<i64: 128, 1>}, {pipeline_mode = #tpu.pipeline_mode<synchronous>, transform_indices = @transform_4, window_bounds = array<i64: 1, 128>}, {pipeline_mode = #tpu.pipeline_mode<synchronous>, transform_indices = @transform_5, window_bounds = array<i64: 1, 128>}, {transform_indices = @transform_6, window_bounds = array<i64: 1, 1>}]} {
    %c0_i32 = arith.constant 0 : i32
    %0 = arith.cmpi eq, %arg0, %c0_i32 : i32
    %1 = arith.extui %0 : i1 to i32
    %c0_i32_0 = arith.constant 0 : i32
    %2 = arith.cmpi ne, %1, %c0_i32_0 : i32
    scf.if %2 {
      %cst_21 = arith.constant 0.000000e+00 : f32
      %49 = vector.broadcast %cst_21 : f32 to vector<128x128xf32>
      %c0_22 = arith.constant 0 : index
      %c0_23 = arith.constant 0 : index
      %50 = vector.load %arg10[%c0_22, %c0_23] : memref<128x128xf32, #tpu.memory_space<vmem>>, vector<128x128xf32>
      tpu.vector_store %arg10[%c0_22, %c0_23], %49 {strides = array<i32>} : memref<128x128xf32, #tpu.memory_space<vmem>>, vector<128x128xf32>,
    } else {
    }
    %3 = arith.index_cast %arg0 : i32 to index
    %4 = memref.load %arg1[%3] : memref<1xi32, #tpu.memory_space<smem>>
    %5 = arith.index_cast %arg0 : i32 to index
    %6 = memref.load %arg2[%5] : memref<1xi32, #tpu.memory_space<smem>>
    %c128_i32 = arith.constant 128 : i32
    %7 = arith.muli %4, %c128_i32 : i32
    %c128_i32_1 = arith.constant 128 : i32
    %8 = arith.muli %6, %c128_i32_1 : i32
    %c0 = arith.constant 0 : index
    %c0_2 = arith.constant 0 : index
    %9 = vector.load %arg3[%c0, %c0_2] : memref<128x32xf32, #tpu.memory_space<vmem>>, vector<128x32xf32>
    %c0_3 = arith.constant 0 : index
    %c0_4 = arith.constant 0 : index
    %10 = vector.load %arg4[%c0_3, %c0_4] : memref<32x128xf32, #tpu.memory_space<vmem>>, vector<32x128xf32>
    %cst = arith.constant dense<0.000000e+00> : vector<128x128xf32>
    %11 = tpu.matmul %9, %10, %cst {dimension_numbers = #tpu.dot_dimension_numbers<[1], [0], [0], [1], [0, 0, 1, 1], [], []>} : vector<128x32xf32>, vector<32x128xf32>, vector<128x128xf32> -> vector<128x128xf32>
    %12 = arith.index_cast %6 : i32 to index
    %c0_5 = arith.constant 0 : index
    %13 = vector.load %arg7[%12, %c0_5] : memref<1x128xf32, #tpu.memory_space<vmem>>, vector<1x128xf32>
    %14 = arith.index_cast %6 : i32 to index
    %c0_6 = arith.constant 0 : index
    %15 = vector.load %arg8[%14, %c0_6] : memref<1x128xi32, #tpu.memory_space<vmem>>, vector<1x128xi32>
    %c0_7 = arith.constant 0 : index
    %c0_8 = arith.constant 0 : index
    %16 = vector.load %arg5[%c0_7, %c0_8] : memref<128x1xf32, #tpu.memory_space<vmem>>, vector<128x1xf32>
    %17 = vector.broadcast %16 : vector<128x1xf32> to vector<128x128xf32>
    %18 = vector.broadcast %13 : vector<1x128xf32> to vector<128x128xf32>
    %19 = arith.addf %17, %18 : vector<128x128xf32>
    %cst_9 = arith.constant 2.000000e+00 : f32
    %20 = vector.broadcast %cst_9 : f32 to vector<128x128xf32>
    %21 = arith.mulf %20, %11 : vector<128x128xf32>
    %22 = arith.subf %19, %21 : vector<128x128xf32>
    %cst_10 = arith.constant 0.000000e+00 : f32
    %23 = vector.broadcast %cst_10 : f32 to vector<128x128xf32>
    %24 = arith.maximumf %22, %23 : vector<128x128xf32>
    %c0_11 = arith.constant 0 : index
    %c0_12 = arith.constant 0 : index
    %25 = vector.load %arg6[%c0_11, %c0_12] : memref<128x1xi32, #tpu.memory_space<vmem>>, vector<128x1xi32>
    %26 = vector.broadcast %25 : vector<128x1xi32> to vector<128x128xi32>
    %27 = vector.broadcast %15 : vector<1x128xi32> to vector<128x128xi32>
    %28 = arith.cmpi eq, %26, %27 : vector<128x128xi32>
    %29 = math.sqrt %24 : vector<128x128xf32>
    %cst_13 = arith.constant 1.000000e+01 : f32
    %30 = vector.broadcast %cst_13 : f32 to vector<128x128xf32>
    %31 = arith.subf %30, %29 : vector<128x128xf32>
    %cst_14 = arith.constant 0.000000e+00 : f32
    %32 = vector.broadcast %cst_14 : f32 to vector<128x128xf32>
    %33 = arith.maximumf %31, %32 : vector<128x128xf32>
    %34 = arith.mulf %33, %33 : vector<128x128xf32>
    %35 = arith.select %28, %24, %34 : vector<128x128xi1>, vector<128x128xf32>
    %c128_i32_15 = arith.constant 128 : i32
    %36 = arith.addi %7, %c128_i32_15 : i32
    %37 = arith.cmpi sgt, %36, %8 : i32
    %c128_i32_16 = arith.constant 128 : i32
    %38 = arith.addi %8, %c128_i32_16 : i32
    %c8_i32 = arith.constant 8 : i32
    %39 = arith.cmpi sgt, %38, %c8_i32 : i32
    %40 = arith.ori %37, %39 : i1
    %41 = arith.extui %40 : i1 to i32
    %c0_i32_17 = arith.constant 0 : i32
    %42 = arith.cmpi ne, %41, %c0_i32_17 : i32
    scf.if %42 {
      %49 = tpu.iota {dimensions = array<i32: 0>} : vector<128x128xi32>
      %50 = vector.broadcast %7 : i32 to vector<128x128xi32>
      %51 = arith.addi %50, %49 : vector<128x128xi32>
      %52 = tpu.iota {dimensions = array<i32: 1>} : vector<128x128xi32>
      %53 = vector.broadcast %8 : i32 to vector<128x128xi32>
      %54 = arith.addi %53, %52 : vector<128x128xi32>
      %55 = arith.cmpi slt, %51, %54 : vector<128x128xi32>
      %c8_i32_21 = arith.constant 8 : i32
      %56 = vector.broadcast %c8_i32_21 : i32 to vector<128x128xi32>
      %57 = arith.cmpi slt, %54, %56 : vector<128x128xi32>
      %58 = arith.andi %55, %57 : vector<128x128xi1>
      %c0_22 = arith.constant 0 : index
      %c0_23 = arith.constant 0 : index
      %59 = vector.load %arg10[%c0_22, %c0_23] : memref<128x128xf32, #tpu.memory_space<vmem>>, vector<128x128xf32>
      %cst_24 = arith.constant 0.000000e+00 : f32
      %60 = vector.broadcast %cst_24 : f32 to vector<128x128xf32>
      %61 = arith.select %58, %35, %60 : vector<128x128xi1>, vector<128x128xf32>
      %62 = arith.addf %59, %61 : vector<128x128xf32>
      %c0_25 = arith.constant 0 : index
      %c0_26 = arith.constant 0 : index
      %63 = vector.load %arg10[%c0_25, %c0_26] : memref<128x128xf32, #tpu.memory_space<vmem>>, vector<128x128xf32>
      tpu.vector_store %arg10[%c0_25, %c0_26], %62 {strides = array<i32>} : memref<128x128xf32, #tpu.memory_space<vmem>>, vector<128x128xf32>,
    } else {
    }
    %true = arith.constant true
    %43 = arith.xori %40, %true : i1
    %44 = arith.extui %43 : i1 to i32
    %c0_i32_18 = arith.constant 0 : i32
    %45 = arith.cmpi ne, %44, %c0_i32_18 : i32
    scf.if %45 {
      %c0_21 = arith.constant 0 : index
      %c0_22 = arith.constant 0 : index
      %49 = vector.load %arg10[%c0_21, %c0_22] : memref<128x128xf32, #tpu.memory_space<vmem>>, vector<128x128xf32>
      %50 = arith.addf %49, %35 : vector<128x128xf32>
      %c0_23 = arith.constant 0 : index
      %c0_24 = arith.constant 0 : index
      %51 = vector.load %arg10[%c0_23, %c0_24] : memref<128x128xf32, #tpu.memory_space<vmem>>, vector<128x128xf32>
      tpu.vector_store %arg10[%c0_23, %c0_24], %50 {strides = array<i32>} : memref<128x128xf32, #tpu.memory_space<vmem>>, vector<128x128xf32>,
    } else {
    }
    %c0_i32_19 = arith.constant 0 : i32
    %46 = arith.cmpi eq, %arg0, %c0_i32_19 : i32
    %47 = arith.extui %46 : i1 to i32
    %c0_i32_20 = arith.constant 0 : i32
    %48 = arith.cmpi ne, %47, %c0_i32_20 : i32
    scf.if %48 {
      %c0_21 = arith.constant 0 : index
      %c0_22 = arith.constant 0 : index
      %49 = vector.load %arg10[%c0_21, %c0_22] : memref<128x128xf32, #tpu.memory_space<vmem>>, vector<128x128xf32>
      %50 = vector.shape_cast %49 : vector<128x128xf32> to vector<1x128x128xf32>
      %cst_23 = arith.constant dense<0.000000e+00> : vector<1xf32>
      %51 = vector.multi_reduction <add>, %50, %cst_23 [1, 2] : vector<1x128x128xf32> to vector<1xf32>
      %52 = vector.shape_cast %51 : vector<1xf32> to vector<1x1x1xf32>
      %53 = vector.extract %52[0, 0, 0] : f32 from vector<1x1x1xf32>
      %cst_24 = arith.constant 0.0357142873 : f32
      %54 = arith.mulf %53, %cst_24 : f32
      %c0_25 = arith.constant 0 : index
      %c0_26 = arith.constant 0 : index
      %55 = memref.load %arg9[%c0_25, %c0_26] : memref<1x1xf32, #tpu.memory_space<smem>>
      memref.store %54, %arg9[%c0_25, %c0_26] : memref<1x1xf32, #tpu.memory_space<smem>>
    } else {
    }
    return
  }
  func.func @transform_0(%arg0: i32, %arg1: memref<1xi32, #tpu.memory_space<smem>>, %arg2: memref<1xi32, #tpu.memory_space<smem>>) -> (i32, i32) {
    %0 = arith.index_cast %arg0 : i32 to index
    %1 = memref.load %arg1[%0] : memref<1xi32, #tpu.memory_space<smem>>
    %c0_i32 = arith.constant 0 : i32
    %c0_i32_0 = arith.constant 0 : i32
    return %1, %c0_i32 : i32, i32
  }
  func.func @transform_1(%arg0: i32, %arg1: memref<1xi32, #tpu.memory_space<smem>>, %arg2: memref<1xi32, #tpu.memory_space<smem>>) -> (i32, i32) {
    %0 = arith.index_cast %arg0 : i32 to index
    %1 = memref.load %arg2[%0] : memref<1xi32, #tpu.memory_space<smem>>
    %c0_i32 = arith.constant 0 : i32
    %c0_i32_0 = arith.constant 0 : i32
    return %c0_i32, %1 : i32, i32
  }
  func.func @transform_2(%arg0: i32, %arg1: memref<1xi32, #tpu.memory_space<smem>>, %arg2: memref<1xi32, #tpu.memory_space<smem>>) -> (i32, i32) {
    %0 = arith.index_cast %arg0 : i32 to index
    %1 = memref.load %arg1[%0] : memref<1xi32, #tpu.memory_space<smem>>
    %c0_i32 = arith.constant 0 : i32
    %c0_i32_0 = arith.constant 0 : i32
    return %1, %c0_i32 : i32, i32
  }
  func.func @transform_3(%arg0: i32, %arg1: memref<1xi32, #tpu.memory_space<smem>>, %arg2: memref<1xi32, #tpu.memory_space<smem>>) -> (i32, i32) {
    %0 = arith.index_cast %arg0 : i32 to index
    %1 = memref.load %arg1[%0] : memref<1xi32, #tpu.memory_space<smem>>
    %c0_i32 = arith.constant 0 : i32
    %c0_i32_0 = arith.constant 0 : i32
    return %1, %c0_i32 : i32, i32
  }
  func.func @transform_4(%arg0: i32, %arg1: memref<1xi32, #tpu.memory_space<smem>>, %arg2: memref<1xi32, #tpu.memory_space<smem>>) -> (i32, i32) {
    %c0_i32 = arith.constant 0 : i32
    %c0_i32_0 = arith.constant 0 : i32
    %c0_i32_1 = arith.constant 0 : i32
    return %c0_i32, %c0_i32_0 : i32, i32
  }
  func.func @transform_5(%arg0: i32, %arg1: memref<1xi32, #tpu.memory_space<smem>>, %arg2: memref<1xi32, #tpu.memory_space<smem>>) -> (i32, i32) {
    %c0_i32 = arith.constant 0 : i32
    %c0_i32_0 = arith.constant 0 : i32
    %c0_i32_1 = arith.constant 0 : i32
    return %c0_i32, %c0_i32_0 : i32, i32
  }
  func.func @transform_6(%arg0: i32, %arg1: memref<1xi32, #tpu.memory_space<smem>>, %arg2: memref<1xi32, #tpu.memory_space<smem>>) -> (i32, i32) {
    %c0_i32 = arith.constant 0 : i32
    %c0_i32_0 = arith.constant 0 : i32
    %c0_i32_1 = arith.constant 0 : i32
    return %c0_i32, %c0_i32_0 : i32, i32
  }
}

</mosaic_0001>

<bundles_post_ra>
// kernel: tpu_custom_call.1
= control target key start
LH: loop header
LB: loop body
LE: loop exit
PB: predicated region body
PF: predicated region fallthrough
CT: control target
= control target key end

     0   :  { %15 = vsyncpa [#allocation7], 0  ;;  %v1147_v0 = vmov 0   ;;  %v1148_v1 = vmov 0.0   ;;  %vm155_vm0 = vcmask 261120   ;;  %s1837_s0 = inlined_call_operand.<no memory space> [shape: s32[1], index: 0, kind: input, shape index: {}]   ;;  %s1838_s1 = inlined_call_operand.<no memory space> [shape: s32[1], index: 1, kind: input, shape index: {}]   ;;  %s1839_s2 = inlined_call_operand.vmem [shape: f32[128,32], index: 2, kind: input, shape index: {}]   ;;  %s1840_s3 = inlined_call_operand.vmem [shape: f32[32,128], index: 3, kind: input, shape index: {}]   ;;  %s1841_s4 = inlined_call_operand.vmem [shape: f32[128,1], index: 4, kind: input, shape index: {}]   ;;  %s1842_s5 = inlined_call_operand.vmem [shape: s32[128,1], index: 5, kind: input, shape index: {}]   ;;  %s1843_s6 = inlined_call_operand.vmem [shape: f32[1,128], index: 6, kind: input, shape index: {}]   ;;  %s1844_s7 = inlined_call_operand.vmem [shape: s32[1,128], index: 7, kind: input, shape index: {}]   ;;  %s1845_s8 = inlined_call_operand.hbm [shape: f32[1,1], index: 8, kind: output, shape index: {}]  }
   0x1   :  { %p90_p0 = scmp.lt.s32.totalorder %s1838_s1, 0  ;;  %1098 = vset.pattern.permute.xlu2 %v1147_v0  ;;  %1097 = vset.pattern.permute.xlu1 %v1147_v0  ;;  %115 = vst [vmem:[#allocation2 + $0x30] sm:$0xff] %v1148_v1  ;;  %s1054_s9 = sshll.u32 %s1837_s0, 4 }
   0x2   :  { %1096 = vset.pattern.permute.xlu0 %v1147_v0  ;;  %116 = vst [vmem:[#allocation2] sm:$0xff] %v1148_v1  ;;  %p83_p1 = scmp.lt.s32.totalorder %s1054_s9, 15  ;;  %s269_s17 = scalar_lea.vmem %s1843_s6, %s1838_s1 }
   0x3   :  { %s91_s12 = scalar_select %p90_p0, %s1838_s1, 0  ;;  %117 = vst [vmem:[#allocation2 + $0x58] sm:$0xff] %v1148_v1  ;;  %v1328_v63 = vld [vmem:[%s269_s17] ss:$0 sm:$0xff] }
   0x4   :  { %118 = vst [vmem:[#allocation2 + $0x18] sm:$0xff] %v1148_v1  ;;  %s1848_s9 = smov (!%p83_p1, %s1054_s9), 15  ;;  %s271_s26 = scalar_lea.vmem %s1844_s7, %s1838_s1 }
   0x5   :  { %s1056_s18 = sshll.u32 %s91_s12, 3  ;;  %119 = vst [vmem:[#allocation2 + $0x50] sm:$0xff] %v1148_v1  ;;  %s1219_s27 = sshll.u32 %s1848_s9, 3 }
   0x6   :  { %s93_s21 = scalar_lea.vmem %s1840_s3, %s1056_s18  ;;  %120 = vst [vmem:[#allocation2 + $0x68] sm:$0xff] %v1148_v1  ;;  %s1225_s29 = scalar_lea.vmem %s1841_s4, %s1219_s27 }
   0x7   :  { %v154_v2 = vld [vmem:[%s93_s21 + $0x18] sm:$0xff]  ;;  %v153_v3 = vld [vmem:[%s93_s21 + $0x10] sm:$0xff]  ;;  %121 = vst [vmem:[#allocation2 + $0x8] sm:$0xff] %v1148_v1  ;;  %v152_v4 = vld [vmem:[%s93_s21 + $0x8] sm:$0xff]  ;;  %s1234_s10 = scalar_lea.vmem %s1839_s2, %s1219_s27  ;;  %s1284_s11 = scalar_lea.vmem %s1842_s5, %s1219_s27 }
   0x8   :  { %216 = vmatpush.msra.mxu0 %v154_v2  ;;  %1079 = vmatpush.msra.mxu1 %v154_v2  ;;  %122 = vst [vmem:[#allocation2 + $0x48] sm:$0xff] %v1148_v1  ;;  %v277_v5 = vld [vmem:[%s1225_s29 + $0x20] sm:$0xff]  ;;  %v275_v6 = vld [vmem:[%s1225_s29 + $0x10] sm:$0xff]  ;;  %v278_v13 = vld [vmem:[%s1225_s29 + $0x28] sm:$0xff]  ;;  %s1061_s13 = sshll.u32 %s1837_s0, 7  ;;  %s1309_s16 = sshll.u32 %s1838_s1, 7 }
   0x9   :  { %1080 = vmatpush.msra.mxu2 %v154_v2  ;;  %1081 = vmatpush.msra.mxu3 %v154_v2  ;;  %123 = vst [vmem:[#allocation2 + $0x40] sm:$0xff] %v1148_v1  ;;  %v273_v7 = vld [vmem:[%s1225_s29] sm:$0xff]  ;;  %v276_v14 = vld [vmem:[%s1225_s29 + $0x18] sm:$0xff]  ;;  %v274_v15 = vld [vmem:[%s1225_s29 + $0x8] sm:$0xff]  ;;  %s773_s20 = sadd.s32 128, %s1061_s13 }
   0xa   :  { %217 = vmatpush.msra.mxu0 %v153_v3  ;;  %1082 = vmatpush.msra.mxu1 %v153_v3  ;;  %124 = vst [vmem:[#allocation2 + $0x20] sm:$0xff] %v1148_v1  ;;  %v151_v8 = vld [vmem:[%s93_s21] sm:$0xff]  ;;  %v136_v16 = vld [vmem:[%s1234_s10 + $0x8] sm:$0xff]  ;;  %v280_v21 = vld [vmem:[%s1225_s29 + $0x38] sm:$0xff]  ;;  %s775_s21 = sadd.s32 128, %s1309_s16  ;;  %p774_p2 = scmp.gt.s32.totalorder %s773_s20, %s1309_s16 }
   0xb   :  { %1083 = vmatpush.msra.mxu2 %v153_v3  ;;  %1084 = vmatpush.msra.mxu3 %v153_v3  ;;  %125 = vst [vmem:[#allocation2 + $0x10] sm:$0xff] %v1148_v1  ;;  %v135_v9 = vld [vmem:[%s1234_s10] sm:$0xff]  ;;  %v140_v17 = vld [vmem:[%s1234_s10 + $0x28] sm:$0xff]  ;;  %v279_v22 = vld [vmem:[%s1225_s29 + $0x30] sm:$0xff]  ;;  %p776_p3 = scmp.gt.s32.totalorder %s775_s21, 8 }
   0xc   :  { %311 = vperm.xlu2 %1098, %v277_v5   ;;  %301 = vperm.xlu1 %1097, %v275_v6   ;;  %126 = vst [vmem:[#allocation2 + $0x38] sm:$0xff] %v1148_v1  ;;  %v139_v10 = vld [vmem:[%s1234_s10 + $0x20] sm:$0xff]  ;;  %v144_v18 = vld [vmem:[%s1234_s10 + $0x48] sm:$0xff]  ;;  %v137_v23 = vld [vmem:[%s1234_s10 + $0x10] sm:$0xff] }
   0xd   :  { %291 = vperm.xlu0 %1096, %v273_v7   ;;  %218 = vmatpush.msra.mxu0 %v152_v4  ;;  %127 = vst [vmem:[#allocation2 + $0x60] sm:$0xff] %v1148_v1  ;;  %v143_v11 = vld [vmem:[%s1234_s10 + $0x40] sm:$0xff]  ;;  %v148_v19 = vld [vmem:[%s1234_s10 + $0x68] sm:$0xff]  ;;  %v141_v24 = vld [vmem:[%s1234_s10 + $0x30] sm:$0xff]  ;;  %p1317_p4 = por %p776_p3, %p774_p2 }
   0xe   :  { %1085 = vmatpush.msra.mxu1 %v152_v4  ;;  %1086 = vmatpush.msra.mxu2 %v152_v4  ;;  %128 = vst [vmem:[#allocation2 + $0x70] sm:$0xff] %v1148_v1  ;;  %v147_v12 = vld [vmem:[%s1234_s10 + $0x60] sm:$0xff]  ;;  %v145_v25 = vld [vmem:[%s1234_s10 + $0x50] sm:$0xff]  ;;  %v284_v27 = vld [vmem:[%s1225_s29 + $0x58] sm:$0xff] }
   0xf   :  { %1087 = vmatpush.msra.mxu3 %v152_v4  ;;  %219 = vmatpush.msra.mxu0 %v151_v8  ;;  %129 = vst [vmem:[#allocation2 + $0x78] sm:$0xff] %v1148_v1  ;;  %v281_v20 = vld [vmem:[%s1225_s29 + $0x40] sm:$0xff]  ;;  %v149_v26 = vld [vmem:[%s1234_s10 + $0x70] sm:$0xff]  ;;  %v282_v29 = vld [vmem:[%s1225_s29 + $0x48] sm:$0xff] }
  0x10   :  { %1088 = vmatpush.msra.mxu1 %v151_v8  ;;  %1089 = vmatpush.msra.mxu2 %v151_v8  ;;  %130 = vst [vmem:[#allocation2 + $0x28] sm:$0xff] %v1148_v1  ;;  %v283_v28 = vld [vmem:[%s1225_s29 + $0x50] sm:$0xff]  ;;  %v138_v30 = vld [vmem:[%s1234_s10 + $0x18] sm:$0xff]  ;;  %v286_v35 = vld [vmem:[%s1225_s29 + $0x68] sm:$0xff] }
  0x11   :  { %1090 = vmatpush.msra.mxu3 %v151_v8  ;;  %1063 = vmatmul.msk.f32.vlgmr.msra.gmra.mxu0 %vm155_vm0, %v135_v9  ;;  %v142_v31 = vld [vmem:[%s1234_s10 + $0x38] sm:$0xff]  ;;  %v287_v34 = vld [vmem:[%s1225_s29 + $0x70] sm:$0xff]  ;;  %v285_v36 = vld [vmem:[%s1225_s29 + $0x60] sm:$0xff] }
  0x12   :  { %1067 = vmatmul.msk.f32.vlgmr.msra.gmra.mxu1 %vm155_vm0, %v139_v10  ;;  %1071 = vmatmul.msk.f32.vlgmr.msra.gmra.mxu2 %vm155_vm0, %v143_v11  ;;  %v146_v32 = vld [vmem:[%s1234_s10 + $0x58] sm:$0xff]  ;;  %v437_v37 = vld [vmem:[%s1284_s11 + $0x8] sm:$0xff]  ;;  %v436_v38 = vld [vmem:[%s1284_s11] sm:$0xff] }
  0x13   :  { %1075 = vmatmul.msk.f32.vlgmr.msra.gmra.mxu3 %vm155_vm0, %v147_v12  ;;  %v150_v33 = vld [vmem:[%s1234_s10 + $0x78] sm:$0xff]  ;;  %v440_v40 = vld [vmem:[%s1284_s11 + $0x20] sm:$0xff]  ;;  %v438_v42 = vld [vmem:[%s1284_s11 + $0x10] sm:$0xff] }
  0x14   :  { %316 = vperm.xlu2 %1098, %v278_v13   ;;  %306 = vperm.xlu1 %1097, %v276_v14   ;;  %v288_v39 = vld [vmem:[%s1225_s29 + $0x78] sm:$0xff]  ;;  %v442_v44 = vld [vmem:[%s1284_s11 + $0x30] sm:$0xff]  ;;  %v441_v45 = vld [vmem:[%s1284_s11 + $0x28] sm:$0xff] }
  0x15   :  { %296 = vperm.xlu0 %1096, %v274_v15   ;;  %v439_v41 = vld [vmem:[%s1284_s11 + $0x18] sm:$0xff]  ;;  %v446_v46 = vld [vmem:[%s1284_s11 + $0x50] sm:$0xff]  ;;  %v445_v47 = vld [vmem:[%s1284_s11 + $0x48] sm:$0xff] }
  0x16   :  { %v443_v43 = vld [vmem:[%s1284_s11 + $0x38] sm:$0xff]  ;;  %v444_v48 = vld [vmem:[%s1284_s11 + $0x40] sm:$0xff]  ;;  %v449_v49 = vld [vmem:[%s1284_s11 + $0x68] sm:$0xff] }
  0x17   :  { %v448_v50 = vld [vmem:[%s1284_s11 + $0x60] sm:$0xff]  ;;  %v447_v51 = vld [vmem:[%s1284_s11 + $0x58] sm:$0xff]  ;;  %v450_v53 = vld [vmem:[%s1284_s11 + $0x70] sm:$0xff] }
  0x18   :  { %v451_v52 = vld [vmem:[%s1284_s11 + $0x78] sm:$0xff] }
  0x19   :  { %1064 = vmatmul.msk.f32.gmra.mxu0 %vm155_vm0, %v136_v16 }
  0x1a   :  { %1068 = vmatmul.msk.f32.gmra.mxu1 %vm155_vm0, %v140_v17  ;;  %1072 = vmatmul.msk.f32.gmra.mxu2 %vm155_vm0, %v144_v18 }
  0x1b   :  { %1076 = vmatmul.msk.f32.gmra.mxu3 %vm155_vm0, %v148_v19 }
  0x1c   :  { %331 = vperm.xlu2 %1098, %v281_v20   ;;  %326 = vperm.xlu1 %1097, %v280_v21  }
  0x1d   :  { %321 = vperm.xlu0 %1096, %v279_v22  }
  0x21   :  { %1065 = vmatmul.msk.f32.gmra.mxu0 %vm155_vm0, %v137_v23 }
  0x22   :  { %1069 = vmatmul.msk.f32.gmra.mxu1 %vm155_vm0, %v141_v24  ;;  %1073 = vmatmul.msk.f32.gmra.mxu2 %vm155_vm0, %v145_v25 }
  0x23   :  { %1077 = vmatmul.msk.f32.gmra.mxu3 %vm155_vm0, %v149_v26 }
  0x24   :  { %346 = vperm.xlu2 %1098, %v284_v27   ;;  %341 = vperm.xlu1 %1097, %v283_v28  }
  0x25   :  { %336 = vperm.xlu0 %1096, %v282_v29  }
  0x29   :  { %1066 = vmatmul.msk.f32.gmra.mxu0 %vm155_vm0, %v138_v30 }
  0x2a   :  { %1070 = vmatmul.msk.f32.gmra.mxu1 %vm155_vm0, %v142_v31  ;;  %1074 = vmatmul.msk.f32.gmra.mxu2 %vm155_vm0, %v146_v32 }
  0x2b   :  { %1078 = vmatmul.msk.f32.gmra.mxu3 %vm155_vm0, %v150_v33 }
  0x2c   :  { %361 = vperm.xlu2 %1098, %v287_v34   ;;  %356 = vperm.xlu1 %1097, %v286_v35  }
  0x2d   :  { %351 = vperm.xlu0 %1096, %v285_v36  }
  0x34   :  { %456 = vperm.xlu2 %1098, %v437_v37   ;;  %453 = vperm.xlu1 %1097, %v436_v38  }
  0x35   :  { %366 = vperm.xlu0 %1096, %v288_v39  }
  0x3c   :  { %465 = vperm.xlu2 %1098, %v440_v40   ;;  %462 = vperm.xlu1 %1097, %v439_v41  }
  0x3d   :  { %459 = vperm.xlu0 %1096, %v438_v42  }
  0x44   :  { %474 = vperm.xlu2 %1098, %v443_v43   ;;  %471 = vperm.xlu1 %1097, %v442_v44  }
  0x45   :  { %468 = vperm.xlu0 %1096, %v441_v45  }
  0x4c   :  { %483 = vperm.xlu2 %1098, %v446_v46   ;;  %480 = vperm.xlu1 %1097, %v445_v47  }
  0x4d   :  { %477 = vperm.xlu0 %1096, %v444_v48  }
  0x54   :  { %492 = vperm.xlu2 %1098, %v449_v49   ;;  %489 = vperm.xlu1 %1097, %v448_v50  }
  0x55   :  { %486 = vperm.xlu0 %1096, %v447_v51  }
  0x5c   :  { %498 = vperm.xlu1 %1097, %v451_v52  }
  0x5d   :  { %495 = vperm.xlu0 %1096, %v450_v53  }
  0x66   :  { %v312_v54 = vpop.permute.xlu2 %311 }
  0x67   :  { %v376_v5 = vadd.f32 %v1328_v63, %v312_v54 }
  0x6e   :  { %v317_v55 = vpop.permute.xlu2 %316 }
  0x6f   :  { %v377_v30 = vadd.f32 %v1328_v63, %v317_v55 }
  0x76   :  { %v332_v56 = vpop.permute.xlu2 %331 }
  0x77   :  { %v380_v33 = vadd.f32 %v1328_v63, %v332_v56 }
  0x7e   :  { %v347_v57 = vpop.permute.xlu2 %346  ;;  %v302_v58 = vpop.permute.xlu1 %301 }
  0x7f   :  { %v292_v59 = vpop.permute.xlu0 %291  ;;  %v1354_v34 = vadd.f32 %v1328_v63, %v347_v57  ;;  %v1357_v39 = vadd.f32 %v1328_v63, %v302_v58 }
  0x80   :  { %v372_v2 = vadd.f32 %v1328_v63, %v292_v59 }
  0x86   :  { %v307_v60 = vpop.permute.xlu1 %306  ;;  %v362_v61 = vpop.permute.xlu2 %361 }
  0x87   :  { %v297_v62 = vpop.permute.xlu0 %296  ;;  %v1360_v40 = vadd.f32 %v1328_v63, %v362_v61  ;;  %v1364_v43 = vadd.f32 %v1328_v63, %v307_v60 }
  0x88   :  { %v373_v18 = vadd.f32 %v1328_v63, %v297_v62 }
  0x8e   :  { %v327_v0 = vpop.permute.xlu1 %326  ;;  %v221_v1 = vpop.f32.mrf.mxu0 }
  0x8f   :  { %v388_v3 = vmul.f32 2.0, %v221_v1  ;;  %v233_v4 = vpop.f32.mrf.mxu1  ;;  %v1332_v7 = vpop.permute.xlu2 %456  ;;  %v1367_v44 = vadd.f32 %v1328_v63, %v327_v0  ;;  %v1391_v0 = vld [vmem:[%s271_s26] ss:$0 sm:$0xff] }
  0x90   :  { %v392_v6 = vmul.f32 2.0, %v233_v4  ;;  %v322_v9 = vpop.permute.xlu0 %321  ;;  %vm502_vm8 = vcmp.eq.s32.totalorder %v1332_v7, %v1391_v0 }
  0x91   :  { %v404_v8 = vsub.f32 %v372_v2, %v388_v3  ;;  %v1371_v47 = vadd.f32 %v1328_v63, %v322_v9 }
  0x92   :  { %v408_v10 = vsub.f32 %v376_v5, %v392_v6 }
  0x93   :  { %v1334_v11 = vmax.f32 %v404_v8, 0.0 }
  0x94   :  { %v1336_v12 = vmax.f32 %v408_v10, 0.0 }
  0x95   :  { %v245_v13 = vpop.f32.mrf.mxu2  ;;  %1101 = vrsqrt.f32 %v1334_v11  ;;  %vm524_vm3 = vcmp.eq.f32.partialorder %v1334_v11, inf  ;;  %vm526_vm4 = vcmp.eq.f32.partialorder %v1334_v11, 0.0  ;;  %v527_v6 = vand.u32 2147483648, %v1334_v11 }
  0x96   :  { %v257_v14 = vpop.f32.mrf.mxu3  ;;  %1103 = vrsqrt.f32 %v1336_v12  ;;  %v342_v15 = vpop.permute.xlu1 %341  ;;  %v396_v31 = vmul.f32 2.0, %v245_v13  ;;  %vm572_vm1 = vcmp.eq.f32.partialorder %v1336_v12, inf  ;;  %vm574_vm2 = vcmp.eq.f32.partialorder %v1336_v12, 0.0 }
  0x97   :  { %v224_v16 = vpop.f32.mrf.mxu0  ;;  %v236_v17 = vpop.f32.mrf.mxu1  ;;  %v1373_v49 = vmul.f32 2.0, %v257_v14  ;;  %v575_v54 = vand.u32 2147483648, %v1336_v12  ;;  %v382_v55 = vadd.f32 %v1328_v63, %v342_v15 }
  0x98   :  { %v389_v19 = vmul.f32 2.0, %v224_v16  ;;  %v1343_v22 = vpop.permute.xlu2 %465  ;;  %v337_v24 = vpop.permute.xlu0 %336  ;;  %v393_v41 = vmul.f32 2.0, %v236_v17  ;;  %v412_v48 = vsub.f32 %v380_v33, %v396_v31 }
  0x99   :  { %v381_v2 = vadd.f32 %v1328_v63, %v337_v24  ;;  %vm505_vm5 = vcmp.eq.s32.totalorder %v1343_v22, %v1391_v0 }
  0x9a   :  { %v405_v20 = vsub.f32 %v373_v18, %v389_v19  ;;  %v409_v56 = vsub.f32 %v377_v30, %v393_v41  ;;  %v1393_v1 = vmax.f32 %v412_v48, 0.0 }
  0x9b   :  { %v1341_v21 = vpop.eup %1101 }
  0x9c   :  { %v1104_v23 = vpop.eup %1103  ;;  %v1345_v25 = vmax.f32 %v405_v20, 0.0  ;;  %v518_v29 = vmul.f32 %v1341_v21, %v1334_v11  ;;  %v1404_v15 = vmax.f32 %v409_v56, 0.0 }
  0x9d   :  { %v248_v26 = vpop.f32.mrf.mxu2  ;;  %v566_v27 = vmul.f32 %v1104_v23, %v1336_v12 }
  0x9e   :  { %v260_v28 = vpop.f32.mrf.mxu3  ;;  %1105 = vrsqrt.f32 %v1345_v25  ;;  %v357_v32 = vpop.permute.xlu1 %356  ;;  %v519_v46 = vmul.f32 %v1341_v21, %v518_v29  ;;  %v397_v3 = vmul.f32 2.0, %v248_v26  ;;  %vm536_vm6 = vcmp.eq.f32.partialorder %v1345_v25, inf }
  0x9f   :  { %v567_v35 = vmul.f32 %v1104_v23, %v566_v27  ;;  %v401_v36 = vmul.f32 2.0, %v260_v28  ;;  %v227_v37 = vpop.f32.mrf.mxu0  ;;  %v239_v38 = vpop.f32.mrf.mxu1  ;;  %v385_v42 = vadd.f32 %v1328_v63, %v357_v32  ;;  %vm538_vm7 = vcmp.eq.f32.partialorder %v1345_v25, 0.0 }
  0xa0   :  { %v520_v52 = vmul.f32 0.5, %v519_v46  ;;  %v1396_v4 = vpop.permute.xlu2 %474  ;;  %v352_v5 = vpop.permute.xlu0 %351  ;;  %v413_v27 = vsub.f32 %v381_v2, %v397_v3  ;;  %v390_v31 = vmul.f32 2.0, %v227_v37  ;;  %v394_v32 = vmul.f32 2.0, %v239_v38 }
  0xa1   :  { %v568_v45 = vmul.f32 0.5, %v567_v35  ;;  %v417_v50 = vsub.f32 %v385_v42, %v401_v36  ;;  %v384_v28 = vadd.f32 %v1328_v63, %v352_v5  ;;  %v539_v46 = vand.u32 2147483648, %v1345_v25 }
  0xa2   :  { %v521_v62 = vsub.f32 1.5, %v520_v52  ;;  %v1428_v48 = vmax.f32 %v413_v27, 0.0 }
  0xa3   :  { %v569_v51 = vsub.f32 1.5, %v568_v45  ;;  %v1380_v57 = vmax.f32 %v417_v50, 0.0  ;;  %v416_v38 = vsub.f32 %v384_v28, %v1373_v49 }
  0xa4   :  { %v1106_v53 = vpop.eup %1105  ;;  %v522_v16 = vmul.f32 %v1341_v21, %v521_v62 }
  0xa5   :  { %v251_v58 = vpop.f32.mrf.mxu2  ;;  %v570_v59 = vmul.f32 %v1104_v23, %v569_v51  ;;  %v530_v60 = vmul.f32 %v1106_v53, %v1345_v25  ;;  %1107 = vrsqrt.f32 %v1380_v57  ;;  %vm680_vm10 = vcmp.eq.f32.partialorder %v1380_v57, inf }
  0xa6   :  { %v398_v61 = vmul.f32 2.0, %v251_v58  ;;  %v263_v23 = vpop.f32.mrf.mxu3  ;;  %v523_v29 = vmul.f32 %v522_v16, %v1334_v11  ;;  %vm682_vm14 = vcmp.eq.f32.partialorder %v1380_v57, 0.0 }
  0xa7   :  { %v571_v8 = vmul.f32 %v570_v59, %v1336_v12  ;;  %v531_v9 = vmul.f32 %v1106_v53, %v530_v60  ;;  %v230_v13 = vpop.f32.mrf.mxu0  ;;  %v242_v14 = vpop.f32.mrf.mxu1 }
  0xa8   :  { %v414_v10 = vsub.f32 %v382_v55, %v398_v61  ;;  %v391_v17 = vmul.f32 2.0, %v230_v13  ;;  %v395_v24 = vmul.f32 2.0, %v242_v14  ;;  %v525_v33 = vsel %vm524_vm3, %v1334_v11, %v523_v29  ;;  %v454_v55 = vpop.permute.xlu1 %453 }
  0xa9   :  { %v573_v18 = vsel %vm572_vm1, %v1336_v12, %v571_v8  ;;  %v532_v19 = vmul.f32 0.5, %v531_v9  ;;  %v528_v45 = vsel %vm526_vm4, %v527_v6, %v525_v33  ;;  %v1457_v61 = vmul.f32 2.0, %v263_v23  ;;  %v367_v6 = vpop.permute.xlu0 %366 }
  0xaa   :  { %v1410_v20 = vmax.f32 %v414_v10, 0.0  ;;  %v576_v26 = vsel %vm574_vm2, %v575_v54, %v573_v18  ;;  %v407_v35 = vsub.f32 %v1364_v43, %v391_v17  ;;  %v411_v37 = vsub.f32 %v1367_v44, %v395_v24  ;;  %v1438_v44 = vpop.permute.xlu2 %483 }
  0xab   :  { %v713_v30 = vsub.f32 10.0, %v576_v26  ;;  %v533_v21 = vsub.f32 1.5, %v532_v19  ;;  %v1422_v36 = vpop.eup %1107  ;;  %v709_v50 = vsub.f32 10.0, %v528_v45  ;;  %v406_v43 = vsub.f32 %v1357_v39, %v390_v31 }
  0xac   :  { %1109 = vrsqrt.f32 %v1410_v20  ;;  %v1433_v54 = vmax.f32 %v411_v37, 0.0  ;;  %v674_v49 = vmul.f32 %v1422_v36, %v1380_v57  ;;  %v1452_v59 = vmax.f32 %v407_v35, 0.0 }
  0xad   :  { %v729_v41 = vmax.f32 %v713_v30, 0.0  ;;  %v534_v42 = vmul.f32 %v1106_v53, %v533_v21  ;;  %v410_v53 = vsub.f32 %v1371_v47, %v394_v32  ;;  %v725_v56 = vmax.f32 %v709_v50, 0.0  ;;  %v254_v3 = vpop.f32.mrf.mxu2 }
  0xae   :  { %1111 = vrsqrt.f32 %v1404_v15  ;;  %v1462_v5 = vmax.f32 %v406_v43, 0.0  ;;  %vm501_vm9 = vcmp.eq.s32.totalorder %v454_v55, %v1391_v0  ;;  %v266_v8 = vpop.f32.mrf.mxu3  ;;  %v675_v14 = vmul.f32 %v1422_v36, %v674_v49 }
  0xaf   :  { %v745_v51 = vmul.f32 %v729_v41, %v729_v41  ;;  %v535_v52 = vmul.f32 %v534_v42, %v1345_v25  ;;  %1113 = vrsqrt.f32 %v1433_v54  ;;  %v741_v2 = vmul.f32 %v725_v56, %v725_v56 }
  0xb0   :  { %v1465_v9 = vmax.f32 %v410_v53, 0.0  ;;  %v1471_v17 = vmul.f32 2.0, %v254_v3  ;;  %1115 = vrsqrt.f32 %v1452_v59  ;;  %v418_v19 = vsub.f32 %v1360_v40, %v1457_v61 }
  0xb1   :  { %v1447_v39 = vsel %vm505_vm5, %v1336_v12, %v745_v51  ;;  %v537_v47 = vsel %vm536_vm6, %v1345_v25, %v535_v52  ;;  %v1460_v12 = vmax.f32 %v416_v38, 0.0  ;;  %v1468_v13 = vsel %vm501_vm9, %v1334_v11, %v741_v2  ;;  %v1518_v53 = vpop.permute.xlu0 %459 }
  0xb2   :  { %v1110_v58 = vpop.eup %1109  ;;  %v540_v60 = vsel %vm538_vm7, %v539_v46, %v537_v47  ;;  %v1479_v24 = vmul.f32 2.0, %v266_v8  ;;  %v676_v26 = vmul.f32 0.5, %v675_v14  ;;  %vm644_vm11 = vcmp.eq.f32.partialorder %v1410_v20, inf  ;;  %v1500_v42 = vpop.permute.xlu2 %492 }
  0xb3   :  { %v638_v62 = vmul.f32 %v1110_v58, %v1410_v20  ;;  %v710_v22 = vsub.f32 10.0, %v540_v60  ;;  %v1483_v28 = vadd.f32 %v1328_v63, %v367_v6  ;;  %1117 = vrsqrt.f32 %v1462_v5 }
  0xb4   :  { %v1475_v18 = vpop.eup %1111  ;;  %vm646_vm12 = vcmp.eq.f32.partialorder %v1410_v20, 0.0  ;;  %v677_v21 = vsub.f32 1.5, %v676_v26  ;;  %v647_v32 = vand.u32 2147483648, %v1410_v20  ;;  %v415_v63 = vsub.f32 %v1354_v34, %v1471_v17 }
  0xb5   :  { %v639_v10 = vmul.f32 %v1110_v58, %v638_v62  ;;  %v726_v16 = vmax.f32 %v710_v22, 0.0  ;;  %v1114_v11 = vpop.eup %1113  ;;  %1119 = vrsqrt.f32 %v1465_v9  ;;  %v419_v41 = vsub.f32 %v1483_v28, %v1479_v24 }
  0xb6   :  { %v602_v30 = vmul.f32 %v1114_v11, %v1433_v54  ;;  %v678_v45 = vmul.f32 %v1422_v36, %v677_v21  ;;  %v1116_v37 = vpop.eup %1115  ;;  %vm608_vm13 = vcmp.eq.f32.partialorder %v1433_v54, inf  ;;  %v611_v7 = vand.u32 2147483648, %v1433_v54 }
  0xb7   :  { %v640_v23 = vmul.f32 0.5, %v639_v10  ;;  %v742_v27 = vmul.f32 %v726_v16, %v726_v16  ;;  %vm610_vm15 = vcmp.eq.f32.partialorder %v1433_v54, 0.0  ;;  %v554_v51 = vmul.f32 %v1116_v37, %v1452_v59 }
  0xb8   :  { %v603_v35 = vmul.f32 %v1114_v11, %v602_v30  ;;  %v679_v50 = vmul.f32 %v678_v45, %v1380_v57  ;;  %vm511_vm0 = vcmp.eq.s32.totalorder %v1438_v44, %v1391_v0  ;;  %vm514_vm1 = vcmp.eq.s32.totalorder %v1500_v42, %v1391_v0 }
  0xb9   :  { %v641_v29 = vsub.f32 1.5, %v640_v23  ;;  %v1492_v31 = vsel %vm502_vm8, %v1345_v25, %v742_v27  ;;  %v578_v25 = vmul.f32 %v1475_v18, %v1404_v15  ;;  %v1118_v36 = vpop.eup %1117  ;;  %v683_v52 = vand.u32 2147483648, %v1380_v57 }
  0xba   :  { %v604_v38 = vmul.f32 0.5, %v603_v35  ;;  %v563_v43 = vand.u32 2147483648, %v1452_v59  ;;  %1121 = vrsqrt.f32 %v1428_v48  ;;  %v555_v47 = vmul.f32 %v1116_v37, %v554_v51 }
  0xbb   :  { %v642_v33 = vmul.f32 %v1110_v58, %v641_v29  ;;  %v579_v55 = vmul.f32 %v1475_v18, %v578_v25  ;;  %v681_v58 = vsel %vm680_vm10, %v1380_v57, %v679_v50  ;;  %vm584_vm2 = vcmp.eq.f32.partialorder %v1404_v15, inf  ;;  %v1120_v60 = vpop.eup %1119 }
  0xbc   :  { %v605_v49 = vsub.f32 1.5, %v604_v38  ;;  %v684_v2 = vsel %vm682_vm14, %v683_v52, %v681_v58  ;;  %vm560_vm3 = vcmp.eq.f32.partialorder %v1452_v59, inf  ;;  %v542_v3 = vmul.f32 %v1118_v36, %v1462_v5 }
  0xbd   :  { %v643_v46 = vmul.f32 %v642_v33, %v1410_v20  ;;  %v580_v22 = vmul.f32 0.5, %v579_v55  ;;  %vm586_vm4 = vcmp.eq.f32.partialorder %v1404_v15, 0.0  ;;  %v722_v10 = vsub.f32 10.0, %v684_v2 }
  0xbe   :  { %v606_v8 = vmul.f32 %v1114_v11, %v605_v49  ;;  %v556_v14 = vmul.f32 0.5, %v555_v47  ;;  %vm562_vm5 = vcmp.eq.f32.partialorder %v1452_v59, 0.0  ;;  %v543_v16 = vmul.f32 %v1118_v36, %v542_v3  ;;  %v469_v3 = vpop.permute.xlu0 %468 }
  0xbf   :  { %v645_v56 = vsel %vm644_vm11, %v1410_v20, %v643_v46  ;;  %v551_v23 = vand.u32 2147483648, %v1462_v5  ;;  %v590_v26 = vmul.f32 %v1120_v60, %v1465_v9  ;;  %v581_v27 = vsub.f32 1.5, %v580_v22 }
  0xc0   :  { %v648_v62 = vsel %vm646_vm12, %v647_v32, %v645_v56  ;;  %v607_v30 = vmul.f32 %v606_v8, %v1433_v54  ;;  %v738_v21 = vmax.f32 %v722_v10, 0.0  ;;  %v1540_v32 = vpop.permute.xlu1 %462  ;;  %v557_v33 = vsub.f32 1.5, %v556_v14  ;;  %v1122_v11 = vpop.eup %1121 }
  0xc1   :  { %v719_v6 = vsub.f32 10.0, %v648_v62  ;;  %vm548_vm6 = vcmp.eq.f32.partialorder %v1462_v5, inf  ;;  %vm508_vm7 = vcmp.eq.s32.totalorder %v1396_v4, %v1391_v0  ;;  %v544_v35 = vmul.f32 0.5, %v543_v16 }
  0xc2   :  { %vm550_vm8 = vcmp.eq.f32.partialorder %v1462_v5, 0.0  ;;  %v591_v45 = vmul.f32 %v1120_v60, %v590_v26  ;;  %v582_v25 = vmul.f32 %v1475_v18, %v581_v27  ;;  %v587_v46 = vand.u32 2147483648, %v1404_v15 }
  0xc3   :  { %v735_v29 = vmax.f32 %v719_v6, 0.0  ;;  %v609_v50 = vsel %vm608_vm13, %v1433_v54, %v607_v30  ;;  %v754_v51 = vmul.f32 %v738_v21, %v738_v21  ;;  %v558_v52 = vmul.f32 %v1116_v37, %v557_v33 }
  0xc4   :  { %vm596_vm9 = vcmp.eq.f32.partialorder %v1465_v9, inf  ;;  %v612_v55 = vsel %vm610_vm15, %v611_v7, %v609_v50  ;;  %v545_v56 = vsub.f32 1.5, %v544_v35  ;;  %v592_v49 = vmul.f32 0.5, %v591_v45 }
  0xc5   :  { %v751_v38 = vmul.f32 %v735_v29, %v735_v29  ;;  %v583_v58 = vmul.f32 %v582_v25, %v1404_v15  ;;  %v716_v47 = vsub.f32 10.0, %v612_v55  ;;  %v1565_v37 = vsel %vm514_vm1, %v1380_v57, %v754_v51 }
  0xc6   :  { %v559_v62 = vmul.f32 %v558_v52, %v1452_v59  ;;  %v546_v7 = vmul.f32 %v1118_v36, %v545_v56  ;;  %v593_v2 = vsub.f32 1.5, %v592_v49  ;;  %v626_v44 = vmul.f32 %v1122_v11, %v1428_v48 }
  0xc7   :  { %v1559_v18 = vsel %vm511_vm0, %v1410_v20, %v751_v38  ;;  %v585_v22 = vsel %vm584_vm2, %v1404_v15, %v583_v58  ;;  %v732_v20 = vmax.f32 %v716_v47, 0.0  ;;  %v599_v42 = vand.u32 2147483648, %v1465_v9 }
  0xc8   :  { %v561_v6 = vsel %vm560_vm3, %v1452_v59, %v559_v62  ;;  %v588_v57 = vsel %vm586_vm4, %v587_v46, %v585_v22  ;;  %v547_v8 = vmul.f32 %v546_v7, %v1462_v5  ;;  %v594_v10 = vmul.f32 %v1120_v60, %v593_v2  ;;  %v472_v35 = vpop.permute.xlu1 %471 }
  0xc9   :  { %v564_v36 = vsel %vm562_vm5, %v563_v43, %v561_v6  ;;  %v714_v14 = vsub.f32 10.0, %v588_v57  ;;  %v748_v16 = vmul.f32 %v732_v20, %v732_v20  ;;  %vm506_vm10 = vcmp.eq.s32.totalorder %v469_v3, %v1391_v0 }
  0xca   :  { %v712_v26 = vsub.f32 10.0, %v564_v36  ;;  %v627_v27 = vmul.f32 %v1122_v11, %v626_v44  ;;  %v549_v29 = vsel %vm548_vm6, %v1462_v5, %v547_v8  ;;  %v595_v30 = vmul.f32 %v594_v10, %v1465_v9  ;;  %v478_v44 = vpop.permute.xlu0 %477 }
  0xcb   :  { %v730_v21 = vmax.f32 %v714_v14, 0.0  ;;  %1123 = vrsqrt.f32 %v1393_v1  ;;  %v1591_v43 = vsel %vm508_vm7, %v1433_v54, %v748_v16  ;;  %v552_v33 = vsel %vm550_vm8, %v551_v23, %v549_v29 }
  0xcc   :  { %v728_v60 = vmax.f32 %v712_v26, 0.0  ;;  %v628_v45 = vmul.f32 0.5, %v627_v27  ;;  %v711_v25 = vsub.f32 10.0, %v552_v33  ;;  %v597_v46 = vsel %vm596_vm9, %v1465_v9, %v595_v30 }
  0xcd   :  { %vm598_vm11 = vcmp.eq.f32.partialorder %v1465_v9, 0.0  ;;  %v746_v38 = vmul.f32 %v730_v21, %v730_v21  ;;  %v1602_v4 = vmax.f32 %v415_v63, 0.0  ;;  %vm504_vm12 = vcmp.eq.s32.totalorder %v1540_v32, %v1391_v0 }
  0xce   :  { %v744_v54 = vmul.f32 %v728_v60, %v728_v60  ;;  %v600_v50 = vsel %vm598_vm11, %v599_v42, %v597_v46  ;;  %v629_v51 = vsub.f32 1.5, %v628_v45  ;;  %v727_v23 = vmax.f32 %v711_v25, 0.0 }
  0xcf   :  { %v715_v52 = vsub.f32 10.0, %v600_v50  ;;  %v1609_v55 = vsel %vm506_vm10, %v1404_v15, %v746_v38  ;;  %1125 = vrsqrt.f32 %v1460_v12  ;;  %v1618_v17 = vmax.f32 %v418_v19, 0.0 }
  0xd0   :  { %v1612_v56 = vsel %vm504_vm12, %v1452_v59, %v744_v54  ;;  %v630_v49 = vmul.f32 %v1122_v11, %v629_v51  ;;  %v1623_v63 = vmax.f32 %v419_v41, 0.0  ;;  %v743_v32 = vmul.f32 %v727_v23, %v727_v23  ;;  %v481_v58 = vpop.permute.xlu1 %480 }
  0xd1   :  { %v1124_v34 = vpop.eup %1123  ;;  %v731_v15 = vmax.f32 %v715_v52, 0.0  ;;  %vm503_vm13 = vcmp.eq.s32.totalorder %v1518_v53, %v1391_v0  ;;  %vm632_vm14 = vcmp.eq.f32.partialorder %v1428_v48, inf  ;;  %v635_v19 = vand.u32 2147483648, %v1428_v48 }
  0xd2   :  { %v631_v59 = vmul.f32 %v630_v49, %v1428_v48  ;;  %v614_v11 = vmul.f32 %v1124_v34, %v1393_v1  ;;  %v1631_v40 = vsel %vm503_vm13, %v1462_v5, %v743_v32  ;;  %1127 = vrsqrt.f32 %v1602_v4 }
  0xd3   :  { %v747_v61 = vmul.f32 %v731_v15, %v731_v15  ;;  %vm507_vm15 = vcmp.eq.s32.totalorder %v472_v35, %v1391_v0  ;;  %vm634_vm0 = vcmp.eq.f32.partialorder %v1428_v48, 0.0  ;;  %1129 = vrsqrt.f32 %v1623_v63  ;;  %v487_v15 = vpop.permute.xlu0 %486 }
  0xd4   :  { %v633_v24 = vsel %vm632_vm14, %v1428_v48, %v631_v59  ;;  %v615_v28 = vmul.f32 %v1124_v34, %v614_v11  ;;  %1131 = vrsqrt.f32 %v1618_v17  ;;  %vm510_vm1 = vcmp.eq.s32.totalorder %v481_v58, %v1391_v0 }
  0xd5   :  { %v1639_v41 = vsel %vm507_vm15, %v1465_v9, %v747_v61  ;;  %v636_v53 = vsel %vm634_vm0, %v635_v19, %v633_v24  ;;  %v1126_v5 = vpop.eup %1125  ;;  %vm620_vm2 = vcmp.eq.f32.partialorder %v1393_v1, inf  ;;  %vm622_vm3 = vcmp.eq.f32.partialorder %v1393_v1, 0.0 }
  0xd6   :  { %v718_v47 = vsub.f32 10.0, %v636_v53  ;;  %v616_v62 = vmul.f32 0.5, %v615_v28  ;;  %v662_v7 = vmul.f32 %v1126_v5, %v1460_v12  ;;  %v623_v27 = vand.u32 2147483648, %v1393_v1 }
  0xd7   :  { %vm668_vm4 = vcmp.eq.f32.partialorder %v1460_v12, inf  ;;  %v671_v51 = vand.u32 2147483648, %v1460_v12  ;;  %vm509_vm5 = vcmp.eq.s32.totalorder %v478_v44, %v1391_v0  ;;  %vm670_vm6 = vcmp.eq.f32.partialorder %v1460_v12, 0.0 }
  0xd8   :  { %v734_v2 = vmax.f32 %v718_v47, 0.0  ;;  %v617_v3 = vsub.f32 1.5, %v616_v62  ;;  %v1128_v22 = vpop.eup %1127  ;;  %v663_v20 = vmul.f32 %v1126_v5, %v662_v7  ;;  %v490_v25 = vpop.permute.xlu1 %489  ;;  %vm656_vm7 = vcmp.eq.f32.partialorder %v1602_v4, inf }
  0xd9   :  { %v650_v42 = vmul.f32 %v1128_v22, %v1602_v4  ;;  %v1130_v57 = vpop.eup %1129  ;;  %vm658_vm8 = vcmp.eq.f32.partialorder %v1602_v4, 0.0  ;;  %v659_v28 = vand.u32 2147483648, %v1602_v4  ;;  %vm704_vm9 = vcmp.eq.f32.partialorder %v1623_v63, inf }
  0xda   :  { %v750_v9 = vmul.f32 %v734_v2, %v734_v2  ;;  %v618_v6 = vmul.f32 %v1124_v34, %v617_v3  ;;  %v664_v36 = vmul.f32 0.5, %v663_v20  ;;  %v698_v16 = vmul.f32 %v1130_v57, %v1623_v63  ;;  %v1132_v26 = vpop.eup %1131 }
  0xdb   :  { %v651_v14 = vmul.f32 %v1128_v22, %v650_v42  ;;  %v707_v2 = vand.u32 2147483648, %v1623_v63  ;;  %vm513_vm10 = vcmp.eq.s32.totalorder %v490_v25, %v1391_v0  ;;  %vm706_vm11 = vcmp.eq.f32.partialorder %v1623_v63, 0.0 }
  0xdc   :  { %v1647_v8 = vsel %vm510_vm1, %v1428_v48, %v750_v9  ;;  %v619_v10 = vmul.f32 %v618_v6, %v1393_v1  ;;  %v665_v29 = vsub.f32 1.5, %v664_v36  ;;  %v699_v60 = vmul.f32 %v1130_v57, %v698_v16 }
  0xdd   :  { %v652_v21 = vmul.f32 0.5, %v651_v14  ;;  %v686_v48 = vmul.f32 %v1132_v26, %v1618_v17  ;;  %vm692_vm12 = vcmp.eq.f32.partialorder %v1618_v17, inf  ;;  %v695_v36 = vand.u32 2147483648, %v1618_v17 }
  0xde   :  { %v621_v30 = vsel %vm620_vm2, %v1393_v1, %v619_v10  ;;  %v666_v35 = vmul.f32 %v1126_v5, %v665_v29  ;;  %v700_v38 = vmul.f32 0.5, %v699_v60  ;;  %vm694_vm13 = vcmp.eq.f32.partialorder %v1618_v17, 0.0  ;;  %v496_v29 = vpop.permute.xlu0 %495 }
  0xdf   :  { %v624_v33 = vsel %vm622_vm3, %v623_v27, %v621_v30  ;;  %v653_v46 = vsub.f32 1.5, %v652_v21  ;;  %v687_v54 = vmul.f32 %v1132_v26, %v686_v48  ;;  %vm512_vm14 = vcmp.eq.s32.totalorder %v487_v15, %v1391_v0 }
  0xe0   :  { %v717_v45 = vsub.f32 10.0, %v624_v33  ;;  %v667_v50 = vmul.f32 %v666_v35, %v1460_v12  ;;  %v701_v49 = vsub.f32 1.5, %v700_v38  ;;  %v499_v42 = vpop.permute.xlu1 %498  ;;  %vm515_vm0 = vcmp.eq.s32.totalorder %v496_v29, %v1391_v0 }
  0xe1   :  { %v654_v52 = vmul.f32 %v1128_v22, %v653_v46  ;;  %v688_v34 = vmul.f32 0.5, %v687_v54  ;;  %vm516_vm15 = vcmp.eq.s32.totalorder %v499_v42, %v1391_v0  ;;  %v817_v25 = vstv (%p1317_p4), %s1309_s16  ;;  %v857_v42 = vld [vmem:[#allocation2 + $0x68] sm:$0xff] (%p1317_p4) }
  0xe2   :  { %v733_v23 = vmax.f32 %v717_v45, 0.0  ;;  %v669_v32 = vsel %vm668_vm4, %v1460_v12, %v667_v50  ;;  %v702_v19 = vmul.f32 %v1130_v57, %v701_v49  ;;  %v781_v45 = vlaneseq (%p1317_p4)  ;;  %v852_v49 = vld [vmem:[#allocation2 + $0x30] sm:$0xff] (%p1317_p4) }
  0xe3   :  { %v672_v11 = vsel %vm670_vm6, %v671_v51, %v669_v32  ;;  %v655_v61 = vmul.f32 %v654_v52, %v1602_v4  ;;  %v689_v53 = vsub.f32 1.5, %v688_v34 }
  0xe4   :  { %v749_v59 = vmul.f32 %v733_v23, %v733_v23  ;;  %v721_v24 = vsub.f32 10.0, %v672_v11  ;;  %v703_v47 = vmul.f32 %v702_v19, %v1623_v63  ;;  %v816_v46 = vand.u32 (%p1317_p4), 127, %v781_v45 }
  0xe5   :  { %v657_v58 = vsel %vm656_vm7, %v1602_v4, %v655_v61  ;;  %v690_v3 = vmul.f32 %v1132_v26, %v689_v53 }
  0xe6   :  { %v1667_v5 = vsel %vm509_vm5, %v1393_v1, %v749_v59  ;;  %v737_v62 = vmax.f32 %v721_v24, 0.0  ;;  %v660_v7 = vsel %vm658_vm8, %v659_v28, %v657_v58  ;;  %v705_v44 = vsel %vm704_vm9, %v1623_v63, %v703_v47  ;;  %v853_v24 = vld [vmem:[#allocation2] sm:$0xff] (%p1317_p4)  ;;  %v854_v58 = vld [vmem:[#allocation2 + $0x58] sm:$0xff] (%p1317_p4) }
  0xe7   :  { %v720_v22 = vsub.f32 10.0, %v660_v7  ;;  %v708_v20 = vsel %vm706_vm11, %v707_v2, %v705_v44  ;;  %v691_v9 = vmul.f32 %v690_v3, %v1618_v17  ;;  %v856_v44 = vld [vmem:[#allocation2 + $0x50] sm:$0xff] (%p1317_p4) }
  0xe8   :  { %v753_v1 = vmul.f32 %v737_v62, %v737_v62  ;;  %v724_v57 = vsub.f32 10.0, %v708_v20  ;;  %v855_v62 = vld [vmem:[#allocation2 + $0x18] sm:$0xff] (%p1317_p4) }
  0xe9   :  { %v736_v6 = vmax.f32 %v720_v22, 0.0  ;;  %v693_v14 = vsel %vm692_vm12, %v1618_v17, %v691_v9 }
  0xea   :  { %v1680_v10 = vsel %vm513_vm10, %v1460_v12, %v753_v1  ;;  %v740_v26 = vmax.f32 %v724_v57, 0.0  ;;  %v696_v27 = vsel %vm694_vm13, %v695_v36, %v693_v14 }
  0xeb   :  { %v752_v16 = vmul.f32 %v736_v6, %v736_v6  ;;  %v723_v30 = vsub.f32 10.0, %v696_v27 }
  0xec   :  { %v756_v60 = vmul.f32 %v740_v26, %v740_v26 }
  0xed   :  { %v1687_v21 = vsel %vm512_vm14, %v1602_v4, %v752_v16  ;;  %v739_v48 = vmax.f32 %v723_v30, 0.0  ;;  %780 = sbr.rel (!%p1317_p4) target bundleno = 266 (0x10a), region = 33  ;;  %v1702_v4 = vstv (%p1317_p4), %s1061_s13  ;;  %v858_v16 = vld [vmem:[#allocation2 + $0x8] sm:$0xff] (%p1317_p4) }
  0xee   :  { %v1690_v12 = vsel %vm516_vm15, %v1623_v63, %v756_v60  ;;  %v1705_v63 = vshrl.u32 (%p1317_p4), %v781_v45, 7  ;;  %v859_v60 = vld [vmem:[#allocation2 + $0x48] sm:$0xff] (%p1317_p4) }
  0xef   :  { %v755_v33 = vmul.f32 %v739_v48, %v739_v48 }
  0xf0   :  { %v799_v0 = vadd.s32 (%p1317_p4), %v1702_v4, %v1705_v63  ;;  %v783_v38 = vadd.s32 (%p1317_p4), 8, %v1705_v63  ;;  %v784_v54 = vadd.s32 (%p1317_p4), 16, %v1705_v63  ;;  %v785_v50 = vadd.s32 (%p1317_p4), 24, %v1705_v63 }
  0xf1   :  { %v1694_v35 = vsel %vm515_vm0, %v1618_v17, %v755_v33  ;;  %v1709_v17 = vadd.s32 (%p1317_p4), %v817_v25, %v816_v46  ;;  %v786_v51 = vadd.s32 (%p1317_p4), 32, %v1705_v63  ;;  %v787_v23 = vadd.s32 (%p1317_p4), 40, %v1705_v63  ;;  %v860_v25 = vld [vmem:[#allocation2 + $0x40] sm:$0xff] (%p1317_p4) }
  0xf2   :  { %v788_v52 = vadd.s32 48, %v1705_v63  ;;  %v800_v34 = vadd.s32 %v1702_v4, %v783_v38  ;;  %v801_v32 = vadd.s32 %v1702_v4, %v784_v54  ;;  %v802_v15 = vadd.s32 %v1702_v4, %v785_v50  ;;  %v861_v38 = vld [vmem:[#allocation2 + $0x20] sm:$0xff] }
  0xf3   :  { %vm819_vm1 = vcmp.lt.s32.totalorder %v799_v0, %v1709_v17  ;;  %vm835_vm2 = vcmp.lt.s32.totalorder %v1709_v17, 8  ;;  %v803_v59 = vadd.s32 %v1702_v4, %v786_v51  ;;  %v804_v11 = vadd.s32 %v1702_v4, %v787_v23 }
  0xf4   :  { %vm836_vm3 = vmand %vm819_vm1, %vm835_vm2  ;;  %v805_v61 = vadd.s32 %v1702_v4, %v788_v52  ;;  %vm820_vm4 = vcmp.lt.s32.totalorder %v800_v34, %v1709_v17  ;;  %vm821_vm5 = vcmp.lt.s32.totalorder %v801_v32, %v1709_v17  ;;  %v789_v28 = vadd.s32 56, %v1705_v63  ;;  %v862_v52 = vld [vmem:[#allocation2 + $0x10] sm:$0xff] }
  0xf5   :  { %v868_v19 = vsel %vm836_vm3, %v1468_v13, 0.0  ;;  %vm837_vm6 = vmand %vm820_vm4, %vm835_vm2  ;;  %vm822_vm7 = vcmp.lt.s32.totalorder %v802_v15, %v1709_v17  ;;  %vm823_vm8 = vcmp.lt.s32.totalorder %v803_v59, %v1709_v17  ;;  %vm824_vm9 = vcmp.lt.s32.totalorder %v804_v11, %v1709_v17  ;;  %v863_v59 = vld [vmem:[#allocation2 + $0x38] sm:$0xff] }
  0xf6   :  { %v884_v53 = vadd.f32 %v868_v19, %v852_v49  ;;  %v869_v47 = vsel %vm837_vm6, %v1492_v31, 0.0  ;;  %vm838_vm10 = vmand %vm821_vm5, %vm835_vm2  ;;  %vm825_vm11 = vcmp.lt.s32.totalorder %v805_v61, %v1709_v17  ;;  %v806_v7 = vadd.s32 %v1702_v4, %v789_v28 }
  0xf7   :  { %v790_v2 = vadd.s32 64, %v1705_v63  ;;  %v885_v3 = vadd.f32 %v869_v47, %v853_v24  ;;  %v870_v22 = vsel %vm838_vm10, %v1631_v40, 0.0  ;;  %vm839_vm12 = vmand %vm822_vm7, %vm835_vm2  ;;  %v791_v1 = vadd.s32 72, %v1705_v63  ;;  %v864_v47 = vld [vmem:[#allocation2 + $0x60] sm:$0xff] }
  0xf8   :  { %900 = vst [vmem:[#allocation2 + $0x30] sm:$0xff] %v884_v53  ;;  %v792_v20 = vadd.s32 80, %v1705_v63  ;;  %v886_v9 = vadd.f32 %v870_v22, %v854_v58  ;;  %v871_v6 = vsel %vm839_vm12, %v1612_v56, 0.0  ;;  %vm840_vm13 = vmand %vm823_vm8, %vm835_vm2  ;;  %vm826_vm14 = vcmp.lt.s32.totalorder %v806_v7, %v1709_v17  ;;  %v866_v22 = vld [vmem:[#allocation2 + $0x78] sm:$0xff] }
  0xf9   :  { %v807_v57 = vadd.s32 %v1702_v4, %v790_v2  ;;  %901 = vst [vmem:[#allocation2] sm:$0xff] %v885_v3  ;;  %v887_v36 = vadd.f32 %v871_v6, %v855_v62  ;;  %v872_v14 = vsel %vm840_vm13, %v1447_v39, 0.0  ;;  %vm841_vm15 = vmand %vm824_vm9, %vm835_vm2  ;;  %v808_v26 = vadd.s32 %v1702_v4, %v791_v1  ;;  %v865_v2 = vld [vmem:[#allocation2 + $0x70] sm:$0xff]  ;;  %v867_v6 = vld [vmem:[#allocation2 + $0x28] sm:$0xff] }
  0xfa   :  { %v809_v27 = vadd.s32 %v1702_v4, %v792_v20  ;;  %902 = vst [vmem:[#allocation2 + $0x58] sm:$0xff] %v886_v9  ;;  %v888_v29 = vadd.f32 %v872_v14, %v856_v44  ;;  %v873_v30 = vsel %vm841_vm15, %v1609_v55, 0.0  ;;  %vm842_vm0 = vmand %vm825_vm11, %vm835_vm2  ;;  %v793_v48 = vadd.s32 88, %v1705_v63 }
  0xfb   :  { %vm827_vm1 = vcmp.lt.s32.totalorder %v807_v57, %v1709_v17  ;;  %903 = vst [vmem:[#allocation2 + $0x18] sm:$0xff] %v887_v36  ;;  %v889_v33 = vadd.f32 %v873_v30, %v857_v42  ;;  %v874_v45 = vsel %vm842_vm0, %v1639_v41, 0.0  ;;  %vm843_vm3 = vmand %vm826_vm14, %vm835_vm2  ;;  %vm828_vm4 = vcmp.lt.s32.totalorder %v808_v26, %v1709_v17 }
  0xfc   :  { %vm829_vm5 = vcmp.lt.s32.totalorder %v809_v27, %v1709_v17  ;;  %904 = vst [vmem:[#allocation2 + $0x50] sm:$0xff] %v888_v29  ;;  %v890_v46 = vadd.f32 %v874_v45, %v858_v16  ;;  %v875_v0 = vsel %vm843_vm3, %v1591_v43, 0.0  ;;  %vm844_vm6 = vmand %vm827_vm1, %vm835_vm2  ;;  %v810_v54 = vadd.s32 %v1702_v4, %v793_v48 }
  0xfd   :  { %v794_v50 = vadd.s32 96, %v1705_v63  ;;  %905 = vst [vmem:[#allocation2 + $0x68] sm:$0xff] %v889_v33  ;;  %v891_v51 = vadd.f32 %v875_v0, %v859_v60  ;;  %v876_v23 = vsel %vm844_vm6, %v1667_v5, 0.0  ;;  %vm845_vm7 = vmand %vm828_vm4, %vm835_vm2  ;;  %v795_v49 = vadd.s32 104, %v1705_v63 }
  0xfe   :  { %v796_v34 = vadd.s32 112, %v1705_v63  ;;  %906 = vst [vmem:[#allocation2 + $0x8] sm:$0xff] %v890_v46  ;;  %v892_v32 = vadd.f32 %v876_v23, %v860_v25  ;;  %v877_v15 = vsel %vm845_vm7, %v1647_v8, 0.0  ;;  %vm846_vm8 = vmand %vm829_vm5, %vm835_vm2  ;;  %vm830_vm9 = vcmp.lt.s32.totalorder %v810_v54, %v1709_v17 }
  0xff   :  { %v811_v11 = vadd.s32 %v1702_v4, %v794_v50  ;;  %907 = vst [vmem:[#allocation2 + $0x48] sm:$0xff] %v891_v51  ;;  %v893_v61 = vadd.f32 %v877_v15, %v861_v38  ;;  %v878_v19 = vsel %vm846_vm8, %v1559_v18, 0.0  ;;  %vm847_vm10 = vmand %vm830_vm9, %vm835_vm2  ;;  %v812_v24 = vadd.s32 %v1702_v4, %v795_v49 }
 0x100   :  { %v813_v28 = vadd.s32 %v1702_v4, %v796_v34  ;;  %908 = vst [vmem:[#allocation2 + $0x40] sm:$0xff] %v892_v32  ;;  %v894_v53 = vadd.f32 %v878_v19, %v862_v52  ;;  %v879_v58 = vsel %vm847_vm10, %v1687_v21, 0.0  ;;  %v797_v62 = vadd.s32 120, %v1705_v63 }
 0x101   :  { %vm831_vm11 = vcmp.lt.s32.totalorder %v811_v11, %v1709_v17  ;;  %909 = vst [vmem:[#allocation2 + $0x20] sm:$0xff] %v893_v61  ;;  %v895_v7 = vadd.f32 %v879_v58, %v863_v59  ;;  %vm832_vm13 = vcmp.lt.s32.totalorder %v812_v24, %v1709_v17 }
 0x102   :  { %vm848_vm12 = vmand %vm831_vm11, %vm835_vm2  ;;  %vm833_vm14 = vcmp.lt.s32.totalorder %v813_v28, %v1709_v17  ;;  %910 = vst [vmem:[#allocation2 + $0x10] sm:$0xff] %v894_v53  ;;  %v814_v44 = vadd.s32 %v1702_v4, %v797_v62 }
 0x103   :  { %v880_v3 = vsel %vm848_vm12, %v1680_v10, 0.0  ;;  %vm849_vm15 = vmand %vm832_vm13, %vm835_vm2  ;;  %911 = vst [vmem:[#allocation2 + $0x38] sm:$0xff] %v895_v7 }
 0x104   :  { %v896_v63 = vadd.f32 %v880_v3, %v864_v47  ;;  %v881_v1 = vsel %vm849_vm15, %v1565_v37, 0.0  ;;  %vm850_vm0 = vmand %vm833_vm14, %vm835_vm2  ;;  %vm834_vm1 = vcmp.lt.s32.totalorder %v814_v44, %v1709_v17 }
 0x105   :  { %v897_v20 = vadd.f32 %v881_v1, %v865_v2  ;;  %v882_v9 = vsel %vm850_vm0, %v1694_v35, 0.0  ;;  %vm851_vm3 = vmand %vm834_vm1, %vm835_vm2 }
 0x106   :  { %912 = vst [vmem:[#allocation2 + $0x60] sm:$0xff] %v896_v63  ;;  %v898_v42 = vadd.f32 %v882_v9, %v866_v22  ;;  %v883_v4 = vsel %vm851_vm3, %v1690_v12, 0.0 }
 0x107   :  { %913 = vst [vmem:[#allocation2 + $0x70] sm:$0xff] %v897_v20  ;;  %v899_v57 = vadd.f32 %v883_v4, %v867_v6 }
 0x108   :  { %914 = vst [vmem:[#allocation2 + $0x78] sm:$0xff] %v898_v42 }
 0x109   :  { %915 = vst [vmem:[#allocation2 + $0x28] sm:$0xff] %v899_v57 }
 0x10a PF:  { %918 = sbr.rel (%p1317_p4) target bundleno = 290 (0x122), region = 37 }
 0x10f   :  { %v919_v36 = vld [vmem:[#allocation2 + $0x30] sm:$0xff]  ;;  %v920_v14 = vld [vmem:[#allocation2] sm:$0xff]  ;;  %v921_v16 = vld [vmem:[#allocation2 + $0x58] sm:$0xff] }
 0x110   :  { %v935_v26 = vadd.f32 %v919_v36, %v1468_v13  ;;  %v936_v27 = vadd.f32 %v920_v14, %v1492_v31  ;;  %v937_v17 = vadd.f32 %v921_v16, %v1631_v40  ;;  %v922_v29 = vld [vmem:[#allocation2 + $0x18] sm:$0xff]  ;;  %v923_v30 = vld [vmem:[#allocation2 + $0x50] sm:$0xff]  ;;  %v924_v60 = vld [vmem:[#allocation2 + $0x68] sm:$0xff] }
 0x111   :  { %v938_v48 = vadd.f32 %v922_v29, %v1612_v56  ;;  %v925_v33 = vld [vmem:[#allocation2 + $0x8] sm:$0xff]  ;;  %v939_v45 = vadd.f32 %v923_v30, %v1447_v39  ;;  %v940_v46 = vadd.f32 %v924_v60, %v1609_v55  ;;  %v927_v0 = vld [vmem:[#allocation2 + $0x40] sm:$0xff]  ;;  %v929_v38 = vld [vmem:[#allocation2 + $0x10] sm:$0xff] }
 0x112   :  { %951 = vst [vmem:[#allocation2 + $0x30] sm:$0xff] %v935_v26  ;;  %v926_v25 = vld [vmem:[#allocation2 + $0x48] sm:$0xff]  ;;  %v941_v13 = vadd.f32 %v925_v33, %v1639_v41  ;;  %v928_v31 = vld [vmem:[#allocation2 + $0x20] sm:$0xff]  ;;  %v943_v56 = vadd.f32 %v927_v0, %v1667_v5  ;;  %v930_v54 = vld [vmem:[#allocation2 + $0x38] sm:$0xff]  ;;  %v945_v55 = vadd.f32 %v929_v38, %v1559_v18 }
 0x113   :  { %952 = vst [vmem:[#allocation2] sm:$0xff] %v936_v27  ;;  %v942_v40 = vadd.f32 %v926_v25, %v1591_v43  ;;  %v944_v39 = vadd.f32 %v928_v31, %v1647_v8  ;;  %v931_v50 = vld [vmem:[#allocation2 + $0x60] sm:$0xff]  ;;  %v932_v51 = vld [vmem:[#allocation2 + $0x70] sm:$0xff]  ;;  %v946_v41 = vadd.f32 %v930_v54, %v1687_v21  ;;  %v933_v23 = vld [vmem:[#allocation2 + $0x78] sm:$0xff] }
 0x114   :  { %953 = vst [vmem:[#allocation2 + $0x58] sm:$0xff] %v937_v17  ;;  %v947_v43 = vadd.f32 %v931_v50, %v1680_v10  ;;  %v934_v52 = vld [vmem:[#allocation2 + $0x28] sm:$0xff]  ;;  %v948_v5 = vadd.f32 %v932_v51, %v1565_v37  ;;  %v949_v49 = vadd.f32 %v933_v23, %v1694_v35 }
 0x115   :  { %954 = vst [vmem:[#allocation2 + $0x18] sm:$0xff] %v938_v48  ;;  %v950_v8 = vadd.f32 %v934_v52, %v1690_v12 }
 0x116   :  { %955 = vst [vmem:[#allocation2 + $0x50] sm:$0xff] %v939_v45 }
 0x117   :  { %956 = vst [vmem:[#allocation2 + $0x68] sm:$0xff] %v940_v46 }
 0x118   :  { %957 = vst [vmem:[#allocation2 + $0x8] sm:$0xff] %v941_v13 }
 0x119   :  { %958 = vst [vmem:[#allocation2 + $0x48] sm:$0xff] %v942_v40 }
 0x11a   :  { %959 = vst [vmem:[#allocation2 + $0x40] sm:$0xff] %v943_v56 }
 0x11b   :  { %960 = vst [vmem:[#allocation2 + $0x20] sm:$0xff] %v944_v39 }
 0x11c   :  { %961 = vst [vmem:[#allocation2 + $0x10] sm:$0xff] %v945_v55 }
 0x11d   :  { %962 = vst [vmem:[#allocation2 + $0x38] sm:$0xff] %v946_v41 }
 0x11e   :  { %963 = vst [vmem:[#allocation2 + $0x60] sm:$0xff] %v947_v43 }
 0x11f   :  { %964 = vst [vmem:[#allocation2 + $0x70] sm:$0xff] %v948_v5 }
 0x120   :  { %965 = vst [vmem:[#allocation2 + $0x78] sm:$0xff] %v949_v49 }
 0x121   :  { %966 = vst [vmem:[#allocation2 + $0x28] sm:$0xff] %v950_v8 }
 0x122 PF:  { %v970_v18 = vld [vmem:[#allocation2 + $0x30] sm:$0xff]  ;;  %v971_v21 = vld [vmem:[#allocation2] sm:$0xff]  ;;  %v972_v34 = vld [vmem:[#allocation2 + $0x58] sm:$0xff]  ;;  %s1018_s29 = sshll.u32 %s1845_s8, 4  ;;  %s1149_s10 = smov [#allocation6]   ;;  %s1019_s29 = int_to_ptr.hbm [resolvable:$true] %s1018_s29 }
 0x123   :  { %v986_v32 = vadd.f32 %v971_v21, %v970_v18  ;;  %v973_v10 = vld [vmem:[#allocation2 + $0x18] sm:$0xff]  ;;  %v974_v59 = vld [vmem:[#allocation2 + $0x50] sm:$0xff]  ;;  %v975_v37 = vld [vmem:[#allocation2 + $0x68] sm:$0xff] }
 0x124   :  { %v976_v19 = vld [vmem:[#allocation2 + $0x8] sm:$0xff]  ;;  %v978_v12 = vld [vmem:[#allocation2 + $0x40] sm:$0xff]  ;;  %v980_v62 = vld [vmem:[#allocation2 + $0x10] sm:$0xff] }
 0x125   :  { %v987_v15 = vadd.f32 %v986_v32, %v972_v34  ;;  %v977_v24 = vld [vmem:[#allocation2 + $0x48] sm:$0xff]  ;;  %v979_v58 = vld [vmem:[#allocation2 + $0x20] sm:$0xff]  ;;  %v981_v2 = vld [vmem:[#allocation2 + $0x38] sm:$0xff] }
 0x126   :  { %v982_v22 = vld [vmem:[#allocation2 + $0x60] sm:$0xff]  ;;  %v983_v63 = vld [vmem:[#allocation2 + $0x70] sm:$0xff] }
 0x127   :  { %v988_v11 = vadd.f32 %v987_v15, %v973_v10  ;;  %v984_v20 = vld [vmem:[#allocation2 + $0x78] sm:$0xff] }
 0x128   :  { %v985_v6 = vld [vmem:[#allocation2 + $0x28] sm:$0xff] }
 0x129   :  { %v989_v61 = vadd.f32 %v988_v11, %v974_v59 }
 0x12b   :  { %v990_v35 = vadd.f32 %v989_v61, %v975_v37 }
 0x12d   :  { %v991_v28 = vadd.f32 %v990_v35, %v976_v19 }
 0x12f   :  { %v992_v53 = vadd.f32 %v991_v28, %v977_v24 }
 0x131   :  { %v993_v47 = vadd.f32 %v992_v53, %v978_v12 }
 0x133   :  { %v994_v7 = vadd.f32 %v993_v47, %v979_v58 }
 0x135   :  { %v995_v3 = vadd.f32 %v994_v7, %v980_v62 }
 0x137   :  { %v996_v44 = vadd.f32 %v995_v3, %v981_v2 }
 0x139   :  { %v997_v1 = vadd.f32 %v996_v44, %v982_v22 }
 0x13b   :  { %v998_v9 = vadd.f32 %v997_v1, %v983_v63 }
 0x13d   :  { %v999_v42 = vadd.f32 %v998_v9, %v984_v20 }
 0x13f   :  { %v1000_v4 = vadd.f32 %v999_v42, %v985_v6 }
 0x141   :  { %1001 = vadd.xlane.f32.xlu0 %v1000_v4 }
 0x1b4   :  { %v1002_v57 = vpop.xlane.xlu0 %1001 }
 0x1b5   :  { %v1003_v36 = vrot.slane %v1002_v57, 4 }
 0x1b7   :  { %v1004_v14 = vadd.f32 %v1003_v36, %v1002_v57 }
 0x1b9   :  { %v1005_v16 = vrot.slane %v1004_v14, 2 }
 0x1bb   :  { %v1006_v26 = vadd.f32 %v1005_v16, %v1004_v14 }
 0x1bd   :  { %v1007_v27 = vrot.slane %v1006_v26, 1 }
 0x1bf   :  { %v1008_v17 = vadd.f32 %v1007_v27, %v1006_v26 }
 0x1c1   :  { %1091 = vpush %v1008_v17 }
 0x1f2   :  { %s1092_s30 = spop %1091 }
 0x1f3   :  { %s1010_s9 = smul.f32 0.035714287, %s1092_s30 }
 0x1f5   :  { %1012 = sst [smem:[#allocation6]] %s1010_s9 }
 0x1f6   :  { %1021 = dma.smem_to_hbm %s1149_s10, 16, %s1019_s29, [#allocation7]  }
 0x1f7   :  { %1145 = dma.done.wait [#allocation7], 16  }
 0x1f8   :  { %1146 = vsyncadd [#allocation7], 4294967280 }
 0x1f9   :  { %1026 = sfence }
 0x1fa   :  { %1027 = vsyncpa [#allocation7], 1 }

</bundles_post_ra>
